<compile_context>
chip_gen: v5e
topology: v5e:2x2
jax: 0.10.0
libtpu: 0.0.40
codegen_flags: <defaults>
</compile_context>

<pallas_src>
import functools

import jax
import jax.numpy as jnp
from jax.experimental import pallas as pl
from jax.experimental.pallas import tpu as pltpu

BN_EPS = 1e-5


def _tdf_kernel(x_ref, w1_ref, w2_ref, g1_ref, b1_ref, g2_ref, b2_ref, o_ref,
                *, B, T, cblk, bn_units, f1, f2):
    c0 = pl.program_id(0) * cblk

    w1 = w1_ref[...]                                    # [f1, bn_units]
    w2 = w2_ref[...]                                    # [bn_units, f2]

    # ---- Linear(f1 -> bn_units) over the whole channel block at once ----
    x = x_ref[...].reshape(B * cblk * T, f1)            # [B*CBLK*T, f1]
    h = jnp.dot(x, w1, preferred_element_type=jnp.float32)
    h = h.reshape(B, cblk, T, bn_units)

    inv_n1 = 1.0 / float(B * T * bn_units)
    inv_n2 = 1.0 / float(B * T * f2)

    # Per-channel: BatchNorm2d (training mode) + ReLU + Linear + BN + ReLU.
    # CBLK is small and static, so this Python loop is fully unrolled.
    for ci in range(cblk):
        c = c0 + ci

        hc = h[:, ci].reshape(B * T, bn_units)           # [BT, bn_units]

        # fused BN: single reduction pass (sum, sumsq), single FMA pass
        mean = jnp.sum(hc) * inv_n1
        var = jnp.sum(hc * hc) * inv_n1 - mean * mean    # biased variance
        scale = g1_ref[c] * jax.lax.rsqrt(var + BN_EPS)
        shift = b1_ref[c] - mean * scale
        hc = jnp.maximum(hc * scale + shift, 0.0)        # BN + ReLU

        # ---- Linear(bn_units -> f2) ----
        yc = jnp.dot(hc, w2, preferred_element_type=jnp.float32)  # [BT, f2]

        mean = jnp.sum(yc) * inv_n2
        var = jnp.sum(yc * yc) * inv_n2 - mean * mean
        scale = g2_ref[c] * jax.lax.rsqrt(var + BN_EPS)
        shift = b2_ref[c] - mean * scale
        yc = jnp.maximum(yc * scale + shift, 0.0)

        o_ref[:, ci, :, :] = yc.reshape(B, T, f2).astype(o_ref.dtype)


def _pick_cblk(B, C, T, f1, f2):
    """Largest divisor of C that (a) keeps the double-buffered in/out blocks
    comfortably inside VMEM and (b) leaves >= 2 grid steps so the parallel
    grid axis can feed both v7x TensorCores."""
    per_ch_bytes = 2 * B * T * (f1 + f2) * 4            # double-buffered in+out
    target = max(1, min(4, (16 * 1024 * 1024) // max(per_ch_bytes, 1)))
    cblk = 1
    for d in range(1, C + 1):
        if C % d == 0 and d <= target and (C // d >= 2 or C == 1):
            cblk = d
    return cblk


def tdf_f1_to_f2(x, w1, w2, g1, b1, g2, b2):
    """x: [B, C, T, f1] float32.  w1: [bn_units, f1], w2: [f2, bn_units]
    (PyTorch Linear layout).  g*, b*: [C] BatchNorm2d affine params."""
    B, C, T, f1 = x.shape
    bn_units = w1.shape[0]
    f2 = w2.shape[0]

    cblk = _pick_cblk(B, C, T, f1, f2)
    grid_c = C // cblk

    # Only the tiny weight matrices get transposed; x / out stay in NCHW.
    w1_t = jnp.transpose(w1, (1, 0))                    # [f1, bn_units]
    w2_t = jnp.transpose(w2, (1, 0))                    # [bn_units, f2]

    kernel = functools.partial(_tdf_kernel, B=B, T=T, cblk=cblk,
                               bn_units=bn_units, f1=f1, f2=f2)

    return pl.pallas_call(
        kernel,
        out_shape=jax.ShapeDtypeStruct((B, C, T, f2), jnp.float32),
        grid_spec=pltpu.PrefetchScalarGridSpec(
            num_scalar_prefetch=0,
            grid=(grid_c,),
            in_specs=[
                pl.BlockSpec((B, cblk, T, f1), lambda c: (0, c, 0, 0)),
                pl.BlockSpec((f1, bn_units), lambda c: (0, 0)),
                pl.BlockSpec((bn_units, f2), lambda c: (0, 0)),
                pl.BlockSpec(memory_space=pltpu.MemorySpace.SMEM),
                pl.BlockSpec(memory_space=pltpu.MemorySpace.SMEM),
                pl.BlockSpec(memory_space=pltpu.MemorySpace.SMEM),
                pl.BlockSpec(memory_space=pltpu.MemorySpace.SMEM),
            ],
            out_specs=pl.BlockSpec((B, cblk, T, f2), lambda c: (0, c, 0, 0)),
        ),
        compiler_params=pltpu.CompilerParams(
            dimension_semantics=("parallel",),
            vmem_limit_bytes=48 * 1024 * 1024),
    )(x, w1_t, w2_t, g1, b1, g2, b2)


def _reference(x, w1, w2, g1, b1, g2, b2):
    """Pure-JAX reference mirroring the PyTorch module (training-mode BN)."""
    def bn_relu(h, g, b):
        mean = jnp.mean(h, axis=(0, 2, 3), keepdims=True)
        var = jnp.mean((h - mean) ** 2, axis=(0, 2, 3), keepdims=True)
        h = (h - mean) / jnp.sqrt(var + BN_EPS)
        h = h * g[None, :, None, None] + b[None, :, None, None]
        return jnp.maximum(h, 0.0)

    h = jnp.einsum('bctf,uf->bctu', x, w1)
    h = bn_relu(h, g1, b1)
    y = jnp.einsum('bctu,fu->bctf', h, w2)
    return bn_relu(y, g2, b2)


if __name__ == "__main__":
    # Module hyperparameters (small, consistent with __init__):
    #   channels=4, f1=32, f2=32, bn_factor=16, min_bn_units=16 -> bn_units=16
    B, C, T = 2, 4, 8
    f1, f2 = 32, 32
    bn_factor, min_bn_units = 16, 16
    bn_units = max(f2 // bn_factor, min_bn_units)

    key = jax.random.PRNGKey(0)
    kx, kw1, kw2 = jax.random.split(key, 3)

    x = jax.random.normal(kx, (B, C, T, f1), dtype=jnp.float32)

    # Deterministic parameter init (synthetic; Kaiming-like scale for Linear).
    w1 = jax.random.uniform(kw1, (bn_units, f1), jnp.float32,
                            minval=-1.0, maxval=1.0) / jnp.sqrt(f1)
    w2 = jax.random.uniform(kw2, (f2, bn_units), jnp.float32,
                            minval=-1.0, maxval=1.0) / jnp.sqrt(bn_units)
    # BatchNorm affine params (non-trivial values to exercise broadcasting).
    g1 = 1.0 + 0.1 * jnp.arange(C, dtype=jnp.float32)
    b1 = 0.05 * jnp.arange(C, dtype=jnp.float32)
    g2 = 1.0 - 0.05 * jnp.arange(C, dtype=jnp.float32)
    b2 = -0.02 * jnp.arange(C, dtype=jnp.float32)

    y = tdf_f1_to_f2(x, w1, w2, g1, b1, g2, b2)
    y = jax.block_until_ready(y)

    y_ref = _reference(x, w1, w2, g1, b1, g2, b2)
    assert y.shape == (B, C, T, f2), y.shape
    assert jnp.allclose(y, y_ref, atol=1e-4, rtol=1e-4), \
        float(jnp.max(jnp.abs(y - y_ref)))

    print("KERNEL_OK")
</pallas_src>

<mosaic_0001>
module attributes {stable_mosaic.version = 11 : i64} {
  func.func @_tdf_kernel(%arg0: i32, %arg1: memref<2x2x8x32xf32, #tpu.memory_space<vmem>>, %arg2: memref<32x16xf32, #tpu.memory_space<vmem>>, %arg3: memref<16x32xf32, #tpu.memory_space<vmem>>, %arg4: memref<4xf32, #tpu.memory_space<smem>>, %arg5: memref<4xf32, #tpu.memory_space<smem>>, %arg6: memref<4xf32, #tpu.memory_space<smem>>, %arg7: memref<4xf32, #tpu.memory_space<smem>>, %arg8: memref<2x2x8x32xf32, #tpu.memory_space<vmem>>) attributes {dimension_semantics = [#tpu.dimension_semantics<parallel>], iteration_bounds = array<i64: 2>, scalar_prefetch = 0 : i64, scratch_operands = 0 : i64, tpu.core_type = #tpu.core_type<tc>, window_params = [{transform_indices = @transform_0, window_bounds = array<i64: 2, 2, 8, 32>}, {pipeline_mode = #tpu.pipeline_mode<synchronous>, transform_indices = @transform_1, window_bounds = array<i64: 32, 16>}, {pipeline_mode = #tpu.pipeline_mode<synchronous>, transform_indices = @transform_2, window_bounds = array<i64: 16, 32>}, {transform_indices = @transform_3, window_bounds = array<i64: 4>}, {transform_indices = @transform_4, window_bounds = array<i64: 4>}, {transform_indices = @transform_5, window_bounds = array<i64: 4>}, {transform_indices = @transform_6, window_bounds = array<i64: 4>}, {transform_indices = @transform_7, window_bounds = array<i64: 2, 2, 8, 32>}]} {
    %c2_i32 = arith.constant 2 : i32
    %0 = arith.muli %arg0, %c2_i32 : i32
    %c0 = arith.constant 0 : index
    %c0_0 = arith.constant 0 : index
    %1 = vector.load %arg2[%c0, %c0_0] : memref<32x16xf32, #tpu.memory_space<vmem>>, vector<32x16xf32>
    %c0_1 = arith.constant 0 : index
    %c0_2 = arith.constant 0 : index
    %2 = vector.load %arg3[%c0_1, %c0_2] : memref<16x32xf32, #tpu.memory_space<vmem>>, vector<16x32xf32>
    %c0_3 = arith.constant 0 : index
    %c0_4 = arith.constant 0 : index
    %c0_5 = arith.constant 0 : index
    %c0_6 = arith.constant 0 : index
    %3 = vector.load %arg1[%c0_3, %c0_4, %c0_5, %c0_6] : memref<2x2x8x32xf32, #tpu.memory_space<vmem>>, vector<2x2x8x32xf32>
    %4 = vector.shape_cast %3 : vector<2x2x8x32xf32> to vector<32x32xf32>
    %cst = arith.constant dense<0.000000e+00> : vector<32x16xf32>
    %5 = tpu.matmul %4, %1, %cst {dimension_numbers = #tpu.dot_dimension_numbers<[1], [0], [0], [1], [0, 0, 1, 1], [], []>} : vector<32x32xf32>, vector<32x16xf32>, vector<32x16xf32> -> vector<32x16xf32>
    %6 = vector.shape_cast %5 : vector<32x16xf32> to vector<2x2x8x16xf32>
    %c0_i32 = arith.constant 0 : i32
    %7 = arith.addi %0, %c0_i32 : i32
    %8 = vector.extract_strided_slice %6 {offsets = [0, 0, 0, 0], sizes = [2, 1, 8, 16], strides = [1, 1, 1, 1]} : vector<2x2x8x16xf32> to vector<2x1x8x16xf32>
    %9 = vector.shape_cast %8 : vector<2x1x8x16xf32> to vector<2x8x16xf32>
    %10 = vector.shape_cast %9 : vector<2x8x16xf32> to vector<16x16xf32>
    %11 = vector.shape_cast %10 : vector<16x16xf32> to vector<1x16x16xf32>
    %cst_7 = arith.constant dense<0.000000e+00> : vector<1xf32>
    %12 = vector.multi_reduction <add>, %11, %cst_7 [1, 2] : vector<1x16x16xf32> to vector<1xf32>
    %13 = vector.shape_cast %12 : vector<1xf32> to vector<1x1x1xf32>
    %14 = vector.extract %13[0, 0, 0] : f32 from vector<1x1x1xf32>
    %cst_8 = arith.constant 3.906250e-03 : f32
    %15 = arith.mulf %14, %cst_8 : f32
    %16 = arith.mulf %10, %10 : vector<16x16xf32>
    %17 = vector.shape_cast %16 : vector<16x16xf32> to vector<1x16x16xf32>
    %cst_9 = arith.constant dense<0.000000e+00> : vector<1xf32>
    %18 = vector.multi_reduction <add>, %17, %cst_9 [1, 2] : vector<1x16x16xf32> to vector<1xf32>
    %19 = vector.shape_cast %18 : vector<1xf32> to vector<1x1x1xf32>
    %20 = vector.extract %19[0, 0, 0] : f32 from vector<1x1x1xf32>
    %cst_10 = arith.constant 3.906250e-03 : f32
    %21 = arith.mulf %20, %cst_10 : f32
    %22 = arith.mulf %15, %15 : f32
    %23 = arith.subf %21, %22 : f32
    %24 = arith.index_cast %7 : i32 to index
    %25 = memref.load %arg4[%24] : memref<4xf32, #tpu.memory_space<smem>>
    %cst_11 = arith.constant 9.99999974E-6 : f32
    %26 = arith.addf %23, %cst_11 : f32
    %27 = math.rsqrt %26 : f32
    %28 = arith.mulf %25, %27 : f32
    %29 = arith.index_cast %7 : i32 to index
    %30 = memref.load %arg5[%29] : memref<4xf32, #tpu.memory_space<smem>>
    %31 = arith.mulf %15, %28 : f32
    %32 = arith.subf %30, %31 : f32
    %33 = vector.broadcast %28 : f32 to vector<16x16xf32>
    %34 = arith.mulf %10, %33 : vector<16x16xf32>
    %35 = vector.broadcast %32 : f32 to vector<16x16xf32>
    %36 = arith.addf %34, %35 : vector<16x16xf32>
    %cst_12 = arith.constant 0.000000e+00 : f32
    %37 = vector.broadcast %cst_12 : f32 to vector<16x16xf32>
    %38 = arith.maximumf %36, %37 : vector<16x16xf32>
    %cst_13 = arith.constant dense<0.000000e+00> : vector<16x32xf32>
    %39 = tpu.matmul %38, %2, %cst_13 {dimension_numbers = #tpu.dot_dimension_numbers<[1], [0], [0], [1], [0, 0, 1, 1], [], []>} : vector<16x16xf32>, vector<16x32xf32>, vector<16x32xf32> -> vector<16x32xf32>
    %40 = vector.shape_cast %39 : vector<16x32xf32> to vector<1x16x32xf32>
    %cst_14 = arith.constant dense<0.000000e+00> : vector<1xf32>
    %41 = vector.multi_reduction <add>, %40, %cst_14 [1, 2] : vector<1x16x32xf32> to vector<1xf32>
    %42 = vector.shape_cast %41 : vector<1xf32> to vector<1x1x1xf32>
    %43 = vector.extract %42[0, 0, 0] : f32 from vector<1x1x1xf32>
    %cst_15 = arith.constant 0.001953125 : f32
    %44 = arith.mulf %43, %cst_15 : f32
    %45 = arith.mulf %39, %39 : vector<16x32xf32>
    %46 = vector.shape_cast %45 : vector<16x32xf32> to vector<1x16x32xf32>
    %cst_16 = arith.constant dense<0.000000e+00> : vector<1xf32>
    %47 = vector.multi_reduction <add>, %46, %cst_16 [1, 2] : vector<1x16x32xf32> to vector<1xf32>
    %48 = vector.shape_cast %47 : vector<1xf32> to vector<1x1x1xf32>
    %49 = vector.extract %48[0, 0, 0] : f32 from vector<1x1x1xf32>
    %cst_17 = arith.constant 0.001953125 : f32
    %50 = arith.mulf %49, %cst_17 : f32
    %51 = arith.mulf %44, %44 : f32
    %52 = arith.subf %50, %51 : f32
    %53 = arith.index_cast %7 : i32 to index
    %54 = memref.load %arg6[%53] : memref<4xf32, #tpu.memory_space<smem>>
    %cst_18 = arith.constant 9.99999974E-6 : f32
    %55 = arith.addf %52, %cst_18 : f32
    %56 = math.rsqrt %55 : f32
    %57 = arith.mulf %54, %56 : f32
    %58 = arith.index_cast %7 : i32 to index
    %59 = memref.load %arg7[%58] : memref<4xf32, #tpu.memory_space<smem>>
    %60 = arith.mulf %44, %57 : f32
    %61 = arith.subf %59, %60 : f32
    %62 = vector.broadcast %57 : f32 to vector<16x32xf32>
    %63 = arith.mulf %39, %62 : vector<16x32xf32>
    %64 = vector.broadcast %61 : f32 to vector<16x32xf32>
    %65 = arith.addf %63, %64 : vector<16x32xf32>
    %cst_19 = arith.constant 0.000000e+00 : f32
    %66 = vector.broadcast %cst_19 : f32 to vector<16x32xf32>
    %67 = arith.maximumf %65, %66 : vector<16x32xf32>
    %68 = vector.shape_cast %67 : vector<16x32xf32> to vector<2x8x32xf32>
    %c0_20 = arith.constant 0 : index
    %c0_21 = arith.constant 0 : index
    %c0_22 = arith.constant 0 : index
    %c0_23 = arith.constant 0 : index
    %69 = vector.load %arg8[%c0_20, %c0_21, %c0_22, %c0_23] : memref<2x2x8x32xf32, #tpu.memory_space<vmem>>, vector<2x1x8x32xf32>
    %70 = vector.shape_cast %69 : vector<2x1x8x32xf32> to vector<2x8x32xf32>
    %71 = vector.shape_cast %68 : vector<2x8x32xf32> to vector<2x1x8x32xf32>
    tpu.vector_store %arg8[%c0_20, %c0_21, %c0_22, %c0_23], %71 {strides = array<i32>} : memref<2x2x8x32xf32, #tpu.memory_space<vmem>>, vector<2x1x8x32xf32>,
    %c1_i32 = arith.constant 1 : i32
    %72 = arith.addi %0, %c1_i32 : i32
    %73 = vector.extract_strided_slice %6 {offsets = [0, 1, 0, 0], sizes = [2, 1, 8, 16], strides = [1, 1, 1, 1]} : vector<2x2x8x16xf32> to vector<2x1x8x16xf32>
    %74 = vector.shape_cast %73 : vector<2x1x8x16xf32> to vector<2x8x16xf32>
    %75 = vector.shape_cast %74 : vector<2x8x16xf32> to vector<16x16xf32>
    %76 = vector.shape_cast %75 : vector<16x16xf32> to vector<1x16x16xf32>
    %cst_24 = arith.constant dense<0.000000e+00> : vector<1xf32>
    %77 = vector.multi_reduction <add>, %76, %cst_24 [1, 2] : vector<1x16x16xf32> to vector<1xf32>
    %78 = vector.shape_cast %77 : vector<1xf32> to vector<1x1x1xf32>
    %79 = vector.extract %78[0, 0, 0] : f32 from vector<1x1x1xf32>
    %cst_25 = arith.constant 3.906250e-03 : f32
    %80 = arith.mulf %79, %cst_25 : f32
    %81 = arith.mulf %75, %75 : vector<16x16xf32>
    %82 = vector.shape_cast %81 : vector<16x16xf32> to vector<1x16x16xf32>
    %cst_26 = arith.constant dense<0.000000e+00> : vector<1xf32>
    %83 = vector.multi_reduction <add>, %82, %cst_26 [1, 2] : vector<1x16x16xf32> to vector<1xf32>
    %84 = vector.shape_cast %83 : vector<1xf32> to vector<1x1x1xf32>
    %85 = vector.extract %84[0, 0, 0] : f32 from vector<1x1x1xf32>
    %cst_27 = arith.constant 3.906250e-03 : f32
    %86 = arith.mulf %85, %cst_27 : f32
    %87 = arith.mulf %80, %80 : f32
    %88 = arith.subf %86, %87 : f32
    %89 = arith.index_cast %72 : i32 to index
    %90 = memref.load %arg4[%89] : memref<4xf32, #tpu.memory_space<smem>>
    %cst_28 = arith.constant 9.99999974E-6 : f32
    %91 = arith.addf %88, %cst_28 : f32
    %92 = math.rsqrt %91 : f32
    %93 = arith.mulf %90, %92 : f32
    %94 = arith.index_cast %72 : i32 to index
    %95 = memref.load %arg5[%94] : memref<4xf32, #tpu.memory_space<smem>>
    %96 = arith.mulf %80, %93 : f32
    %97 = arith.subf %95, %96 : f32
    %98 = vector.broadcast %93 : f32 to vector<16x16xf32>
    %99 = arith.mulf %75, %98 : vector<16x16xf32>
    %100 = vector.broadcast %97 : f32 to vector<16x16xf32>
    %101 = arith.addf %99, %100 : vector<16x16xf32>
    %cst_29 = arith.constant 0.000000e+00 : f32
    %102 = vector.broadcast %cst_29 : f32 to vector<16x16xf32>
    %103 = arith.maximumf %101, %102 : vector<16x16xf32>
    %cst_30 = arith.constant dense<0.000000e+00> : vector<16x32xf32>
    %104 = tpu.matmul %103, %2, %cst_30 {dimension_numbers = #tpu.dot_dimension_numbers<[1], [0], [0], [1], [0, 0, 1, 1], [], []>} : vector<16x16xf32>, vector<16x32xf32>, vector<16x32xf32> -> vector<16x32xf32>
    %105 = vector.shape_cast %104 : vector<16x32xf32> to vector<1x16x32xf32>
    %cst_31 = arith.constant dense<0.000000e+00> : vector<1xf32>
    %106 = vector.multi_reduction <add>, %105, %cst_31 [1, 2] : vector<1x16x32xf32> to vector<1xf32>
    %107 = vector.shape_cast %106 : vector<1xf32> to vector<1x1x1xf32>
    %108 = vector.extract %107[0, 0, 0] : f32 from vector<1x1x1xf32>
    %cst_32 = arith.constant 0.001953125 : f32
    %109 = arith.mulf %108, %cst_32 : f32
    %110 = arith.mulf %104, %104 : vector<16x32xf32>
    %111 = vector.shape_cast %110 : vector<16x32xf32> to vector<1x16x32xf32>
    %cst_33 = arith.constant dense<0.000000e+00> : vector<1xf32>
    %112 = vector.multi_reduction <add>, %111, %cst_33 [1, 2] : vector<1x16x32xf32> to vector<1xf32>
    %113 = vector.shape_cast %112 : vector<1xf32> to vector<1x1x1xf32>
    %114 = vector.extract %113[0, 0, 0] : f32 from vector<1x1x1xf32>
    %cst_34 = arith.constant 0.001953125 : f32
    %115 = arith.mulf %114, %cst_34 : f32
    %116 = arith.mulf %109, %109 : f32
    %117 = arith.subf %115, %116 : f32
    %118 = arith.index_cast %72 : i32 to index
    %119 = memref.load %arg6[%118] : memref<4xf32, #tpu.memory_space<smem>>
    %cst_35 = arith.constant 9.99999974E-6 : f32
    %120 = arith.addf %117, %cst_35 : f32
    %121 = math.rsqrt %120 : f32
    %122 = arith.mulf %119, %121 : f32
    %123 = arith.index_cast %72 : i32 to index
    %124 = memref.load %arg7[%123] : memref<4xf32, #tpu.memory_space<smem>>
    %125 = arith.mulf %109, %122 : f32
    %126 = arith.subf %124, %125 : f32
    %127 = vector.broadcast %122 : f32 to vector<16x32xf32>
    %128 = arith.mulf %104, %127 : vector<16x32xf32>
    %129 = vector.broadcast %126 : f32 to vector<16x32xf32>
    %130 = arith.addf %128, %129 : vector<16x32xf32>
    %cst_36 = arith.constant 0.000000e+00 : f32
    %131 = vector.broadcast %cst_36 : f32 to vector<16x32xf32>
    %132 = arith.maximumf %130, %131 : vector<16x32xf32>
    %133 = vector.shape_cast %132 : vector<16x32xf32> to vector<2x8x32xf32>
    %c0_37 = arith.constant 0 : index
    %c1 = arith.constant 1 : index
    %c0_38 = arith.constant 0 : index
    %c0_39 = arith.constant 0 : index
    %134 = vector.load %arg8[%c0_37, %c1, %c0_38, %c0_39] : memref<2x2x8x32xf32, #tpu.memory_space<vmem>>, vector<2x1x8x32xf32>
    %135 = vector.shape_cast %134 : vector<2x1x8x32xf32> to vector<2x8x32xf32>
    %136 = vector.shape_cast %133 : vector<2x8x32xf32> to vector<2x1x8x32xf32>
    tpu.vector_store %arg8[%c0_37, %c1, %c0_38, %c0_39], %136 {strides = array<i32>} : memref<2x2x8x32xf32, #tpu.memory_space<vmem>>, vector<2x1x8x32xf32>,
    return
  }
  func.func @transform_0(%arg0: i32) -> (i32, i32, i32, i32) {
    %c0_i32 = arith.constant 0 : i32
    %c0_i32_0 = arith.constant 0 : i32
    %c0_i32_1 = arith.constant 0 : i32
    %c0_i32_2 = arith.constant 0 : i32
    return %c0_i32, %arg0, %c0_i32_0, %c0_i32_1 : i32, i32, i32, i32
  }
  func.func @transform_1(%arg0: i32) -> (i32, i32) {
    %c0_i32 = arith.constant 0 : i32
    %c0_i32_0 = arith.constant 0 : i32
    %c0_i32_1 = arith.constant 0 : i32
    return %c0_i32, %c0_i32_0 : i32, i32
  }
  func.func @transform_2(%arg0: i32) -> (i32, i32) {
    %c0_i32 = arith.constant 0 : i32
    %c0_i32_0 = arith.constant 0 : i32
    %c0_i32_1 = arith.constant 0 : i32
    return %c0_i32, %c0_i32_0 : i32, i32
  }
  func.func @transform_3(%arg0: i32) -> i32 {
    %c0_i32 = arith.constant 0 : i32
    %c0_i32_0 = arith.constant 0 : i32
    return %c0_i32 : i32
  }
  func.func @transform_4(%arg0: i32) -> i32 {
    %c0_i32 = arith.constant 0 : i32
    %c0_i32_0 = arith.constant 0 : i32
    return %c0_i32 : i32
  }
  func.func @transform_5(%arg0: i32) -> i32 {
    %c0_i32 = arith.constant 0 : i32
    %c0_i32_0 = arith.constant 0 : i32
    return %c0_i32 : i32
  }
  func.func @transform_6(%arg0: i32) -> i32 {
    %c0_i32 = arith.constant 0 : i32
    %c0_i32_0 = arith.constant 0 : i32
    return %c0_i32 : i32
  }
  func.func @transform_7(%arg0: i32) -> (i32, i32, i32, i32) {
    %c0_i32 = arith.constant 0 : i32
    %c0_i32_0 = arith.constant 0 : i32
    %c0_i32_1 = arith.constant 0 : i32
    %c0_i32_2 = arith.constant 0 : i32
    return %c0_i32, %arg0, %c0_i32_0, %c0_i32_1 : i32, i32, i32, i32
  }
}

</mosaic_0001>

<bundles_post_ra>
// kernel: tpu_custom_call.1
= control target key start
LH: loop header
LB: loop body
LE: loop exit
PB: predicated region body
PF: predicated region fallthrough
CT: control target
= control target key end

     0   :  { %s1515_s0 = inlined_call_operand.hbm [shape: f32[2,4,8,32], index: 0, kind: input, shape index: {}]   ;;  %s1516_s1 = inlined_call_operand.vmem [shape: f32[32,16], index: 1, kind: input, shape index: {}]   ;;  %s1517_s2 = inlined_call_operand.vmem [shape: f32[16,32], index: 2, kind: input, shape index: {}]   ;;  %s1518_s3 = inlined_call_operand.vmem [shape: f32[4], index: 3, kind: input, shape index: {}]   ;;  %s1519_s4 = inlined_call_operand.vmem [shape: f32[4], index: 4, kind: input, shape index: {}]   ;;  %s1520_s5 = inlined_call_operand.vmem [shape: f32[4], index: 5, kind: input, shape index: {}]   ;;  %s1521_s6 = inlined_call_operand.vmem [shape: f32[4], index: 6, kind: input, shape index: {}]   ;;  %s1522_s7 = inlined_call_operand.hbm [shape: f32[2,4,8,32], index: 7, kind: output, shape index: {}]  }
   0x1   :  { %1523 = sst [smem:[#allocation24_spill]] %s1519_s4 }
   0x2   :  { %12 = vsyncpa [#allocation3], 0 }
   0x3   :  { %14 = vsyncpa [#allocation3 + $0x1], 0 }
   0x4   :  { %15 = vsyncpa [#allocation5], 0 }
   0x5   :  { %16 = vsyncpa [#allocation8], 0 }
   0x6   :  { %17 = vsyncpa [#allocation11], 0 }
   0x7   :  { %18 = vsyncpa [#allocation4], 0 }
   0x8   :  { %20 = vsyncpa [#allocation4 + $0x1], 0  ;;  %s1223_s24 = smov 0   ;;  %s1225_s25 = smov 0  }
   0x9   :  { %s1227_s26 = smov 0   ;;  %s1229_s27 = smov 0  }
   0xa LB: > { %s1244_s28 = sadd.s32 4294967295, %s1164_s27   ;;  %s873_s29 = sadd.s32 4294967294, %s1164_s27   ;;  %s1164_s27 = sphi %s1229_s27, %s1535_s27   ;;  %s1160_s26 = sphi %s1227_s26, %s1534_s26   ;;  %s1156_s25 = sphi %s1225_s25, %s1533_s25   ;;  %s1152_s24 = sphi %s1223_s24, %s1532_s24  }
   0xb   : > { %s1248_s30 = sadd.s32 1, %s1164_s27   ;;  %s33_s8 = sadd.s32 1, %s1160_s26 }
   0xc   : > { %s30_s9 = ssub.s32 %s1164_s27, %s1248_s30  ;;  %p40_p0 = scmp.ne.s32.totalorder %s1160_s26, %s1156_s25 }
   0xd   : > { %p31_p1 = scmp.eq.s32.totalorder %s30_s9, 0  ;;  %p41_p2 = scmp.eq.s32.totalorder %s1164_s27, 0 }
   0xe   : > { %p46_p3 = scmp.ne.s32.totalorder %s1156_s25, %s1152_s24  ;;  %p47_p4 = scmp.eq.s32.totalorder %s1244_s28, 0 }
   0xf   : > { %s1260_s10 = scalar_select %p31_p1, %s1160_s26, %s33_s8  }
  0x10   : > { %p1262_p5 = por %p41_p2, %p40_p0  ;;  %p1268_p6 = por %p47_p4, %p46_p3 }
  0x11   : > { %1524 = sst [smem:[#allocation23_spill]] %s1260_s10  ;;  %p196_p7 = scmp.eq.s32.totalorder %s1244_s28, 1 }
  0x12   : > { %p202_p8 = scmp.eq.s32.totalorder %s873_s29, 1  ;;  %p874_p9 = scmp.ge.s32.totalorder %s1164_s27, 1 }
  0x13   : > { %p209_p10 = scmp.lt.s32.totalorder %s1164_s27, 3  ;;  %p1275_p11 = por %p196_p7, %p40_p0 }
  0x14   : > { %p1279_p12 = por %p202_p8, %p46_p3  ;;  %s1530_s4 = sld [smem:[#allocation24_spill]] }
  0x15   : > { %p1283_p13 = pnand %p874_p9, %p209_p10  ;;  %s227_s21 = sshll.u32 %s1518_s3, 4  ;;  %s228_s21 = int_to_ptr.vmem [resolvable:$true] %s227_s21 }
  0x16   : > { %s247_s29 = sshll.u32 %s1520_s5, 4  ;;  %s1166_s8 = smov [#allocation7]   ;;  %s248_s29 = int_to_ptr.vmem [resolvable:$true] %s247_s29 }
  0x17   : > { %p971_p1 = pneg %p1283_p13  ;;  %s1167_s9 = smov [#allocation6]  }
  0x18   : > { %s1168_s16 = smov [#allocation9]   ;;  %s257_s10 = sshll.u32 %s1521_s6, 4  ;;  %s258_s10 = int_to_ptr.vmem [resolvable:$true] %s257_s10 }
  0x19   : > { %p972_p0 = pnand %p971_p1, %p47_p4  ;;  %s1169_s19 = smov [#allocation10]  }
  0x1a   : > { %s237_s18 = sshll.u32 %s1530_s4, 4  ;;  %p879_p2 = scmp.ge.s32.totalorder %s1164_s27, 2  ;;  %s238_s18 = int_to_ptr.vmem [resolvable:$true] %s237_s18 }
  0x1b   : > { %977 = dma.vmem_to_smem (!%p972_p0), %s238_s18, 16, %s1166_s8, [#allocation8]  }
  0x1c   : > { %974 = dma.vmem_to_smem (!%p972_p0), %s228_s21, 16, %s1167_s9, [#allocation5]  }
  0x1d   : > { %980 = dma.vmem_to_smem (!%p972_p0), %s248_s29, 16, %s1168_s16, [#allocation8]  }
  0x1e   : > { %983 = dma.vmem_to_smem (!%p972_p0), %s258_s10, 16, %s1169_s19, [#allocation11]  }
  0x1f   : > { %264 = sbr.rel (%p879_p2) target bundleno = 50 (0x32), region = 40 }
  0x24   : > { %s268_s18 = sand.u32 1, %s1160_s26   ;;  %s908_s20 = sshll.u32 %s1164_s27, 4 }
  0x25   : > { %s880_s21 = sshll.u32 %s268_s18, 5  ;;  %s277_s23 = scalar_lea.hbm %s1515_s0, %s908_s20 }
  0x26   : > { %s946_s10 = scalar_select %p1262_p5, [#allocation0], [#allocation17] }
  0x27   : > { %s290_s29 = sshll.u32 %s277_s23, 4  ;;  %s272_s8 = scalar_lea.vmem [#allocation2], %s880_s21  ;;  %s291_s29 = int_to_ptr.hbm [resolvable:$true] %s290_s29 }
  0x28   : > { %s292_s9 = sshll.u32 %s272_s8, 4  ;;  %s282_s16 = sld [smem:[%s946_s10]]   ;;  %s293_s9 = int_to_ptr.vmem [resolvable:$true] %s292_s9 }
  0x29   : > { %s1170_s17 = smov 512   ;;  %s1171_s19 = smov 256  }
  0x2a   : > { %947 = sst [smem:[#allocation14]] (%p1262_p5), %s1170_s17  ;;  %s1172_s22 = smov 2  }
  0x2b   : > { %948 = sst [smem:[#allocation14 + $0x1]] (%p1262_p5), %s1171_s19  ;;  %s1173_s20 = smov 128  }
  0x2c   : > { %949 = sst [smem:[#allocation14 + $0x2]] (%p1262_p5), %s1172_s22  ;;  %s1174_s23 = smov 8  }
  0x2d   : > { %950 = sst [smem:[#allocation14 + $0x3]] (%p1262_p5), %s1173_s20  ;;  %s269_s10 = scalar_lea.sflag [#allocation3], %s268_s18 }
  0x2e   : > { %s883_s4 = sshll.u32 %s282_s16, 26  ;;  %951 = sst [smem:[#allocation14 + $0x4]] (%p1262_p5), %s1173_s20 }
  0x2f   : > { %s884_s21 = sadd.s32 134217728, %s883_s4  ;;  %952 = sst [smem:[#allocation14 + $0x5]] (%p1262_p5), %s1174_s23 }
  0x30   : > { %s1175_s8 = smov [#allocation13]  }
  0x31   : > { %953 = dma.general (%p1262_p5), %s291_s29, 512, %s293_s9, %s269_s10, %s1175_s8, [#allocation14], %s884_s21, 0  }
  0x32 PF: > { %317 = sbr.rel (%p1283_p13) target bundleno = 1389 (0x56d), region = 48  ;;  %s1330_s17 = sand.u32 (!%p1283_p13), 1, %s1156_s25  }
  0x33   : > { %s886_s16 = sshll.u32 (!%p1283_p13), %s1330_s17, 5  ;;  %s320_s19 = scalar_lea.sflag (!%p1283_p13), [#allocation3], %s1330_s17 }
  0x34   : > { %s1336_s22 = scalar_lea.vmem (!%p1283_p13), [#allocation2], %s886_s16 }
  0x37   : > { %1131 = dma.done.wait (%p1268_p6), %s320_s19, 512  }
  0x38   : > { %1133 = vsyncadd (%p1268_p6), %s320_s19, 4294966784 }
  0x39   : > { %1135 = dma.done.wait (%p47_p4), [#allocation5], 16  }
  0x3a   : > { %1137 = vsyncadd (%p47_p4), [#allocation5], 4294967280 }
  0x3b   : > { %1139 = dma.done.wait (%p47_p4), [#allocation8], 32  }
  0x3c   : > { %1141 = vsyncadd (%p47_p4), [#allocation8], 4294967264 }
  0x3d   : > { %1143 = dma.done.wait (%p47_p4), [#allocation11], 16  }
  0x3e   : > { %1145 = vsyncadd (%p47_p4), [#allocation11], 4294967280 }
  0x3f   : > { %349 = sfence }
  0x40   : > { %v382_v0 = vld [vmem:[%s1516_s1 + $0x18] sm:$0xff]  ;;  %v381_v1 = vld [vmem:[%s1516_s1 + $0x10] sm:$0xff]  ;;  %v380_v2 = vld [vmem:[%s1516_s1 + $0x8] sm:$0xff]  ;;  %vm389_vm0 = vcmask 261120   ;;  %vm431_vm1 = vcmask 130048   ;;  %s1399_s20 = sshll.u32 %s1244_s28, 1 }
  0x41   : > { %910 = vmatpush.msra.mxu3 %v382_v0  ;;  %414 = vmatpush.msra.mxu0 %v382_v0  ;;  %v379_v3 = vld [vmem:[%s1516_s1] sm:$0xff]  ;;  %v387_v4 = vld [vmem:[%s1336_s22 + $0x10] sm:$0xff]  ;;  %v384_v38 = vld [vmem:[%s1517_s2 + $0x8] sm:$0xff]  ;;  %s462_s4 = sld [smem:[#allocation6 + %s1399_s20]] }
  0x42   : > { %v385_v5 = vld [vmem:[%s1336_s22] sm:$0xff]  ;;  %508 = vmatpush.msra.mxu1 %v384_v38  ;;  %652 = vmatpush.msra.mxu2 %v384_v38  ;;  %v388_v40 = vld [vmem:[%s1336_s22 + $0x18] sm:$0xff]  ;;  %v386_v41 = vld [vmem:[%s1336_s22 + $0x8] sm:$0xff] }
  0x43   : > { %911 = vmatpush.msra.mxu3 %v381_v1  ;;  %415 = vmatpush.msra.mxu0 %v381_v1  ;;  %v383_v39 = vld [vmem:[%s1517_s2] sm:$0xff] }
  0x44   : > { %509 = vmatpush.msra.mxu1 %v383_v39  ;;  %653 = vmatpush.msra.mxu2 %v383_v39 }
  0x45   : > { %912 = vmatpush.msra.mxu3 %v380_v2  ;;  %416 = vmatpush.msra.mxu0 %v380_v2 }
  0x47   : > { %913 = vmatpush.msra.mxu3 %v379_v3  ;;  %417 = vmatpush.msra.mxu0 %v379_v3 }
  0x48   : > { %895 = vmatmul.msk.f32.vlgmr.msra.gmra.mxu3 %vm389_vm0, %v387_v4  ;;  %893 = vmatmul.msk.f32.vlgmr.msra.gmra.mxu0 %vm389_vm0, %v385_v5 }
  0x50   : > { %896 = vmatmul.msk.f32.gmra.mxu3 %vm389_vm0, %v388_v40  ;;  %894 = vmatmul.msk.f32.gmra.mxu0 %vm389_vm0, %v386_v41 }
  0xc5   : > { %v1370_v6 = vpop.f32.mrf.mxu0 }
  0xc6   : > { %v432_v7 = vsel %vm431_vm1, %v1370_v6, 0.0  ;;  %v445_v11 = vmul.f32 %v1370_v6, %v1370_v6 }
  0xc8   : > { %v447_v13 = vsel %vm431_vm1, %v445_v11, 0.0 }
  0xcb   : > { %v1374_v8 = vpop.f32.mrf.mxu3 }
  0xcc   : > { %v433_v9 = vsel %vm431_vm1, %v1374_v8, 0.0  ;;  %v446_v12 = vmul.f32 %v1374_v8, %v1374_v8 }
  0xcd   : > { %v434_v10 = vadd.f32 %v433_v9, %v432_v7  ;;  %v1408_v50 = vpop.f32.mrf.mxu0 }
  0xce   : > { %v448_v14 = vsel %vm431_vm1, %v446_v12, 0.0  ;;  %v589_v52 = vmul.f32 %v1408_v50, %v1408_v50  ;;  %v576_v54 = vsel %vm431_vm1, %v1408_v50, 0.0 }
  0xcf   : > { %435 = vadd.xlane.f32.xlu0 %v434_v10  ;;  %v449_v15 = vadd.f32 %v448_v14, %v447_v13 }
  0xd0   : > { %v591_v57 = vsel %vm431_vm1, %v589_v52, 0.0 }
  0xd3   : > { %v1410_v51 = vpop.f32.mrf.mxu3 }
  0xd4   : > { %v590_v53 = vmul.f32 %v1410_v51, %v1410_v51  ;;  %v577_v55 = vsel %vm431_vm1, %v1410_v51, 0.0 }
  0xd5   : > { %v578_v56 = vadd.f32 %v577_v55, %v576_v54 }
  0xd6   : > { %v592_v58 = vsel %vm431_vm1, %v590_v53, 0.0 }
  0xd7   : > { %450 = vadd.xlane.f32.xlu0 %v449_v15  ;;  %579 = vadd.xlane.f32.xlu2 %v578_v56  ;;  %v593_v59 = vadd.f32 %v592_v58, %v591_v57 }
  0xdf   : > { %594 = vadd.xlane.f32.xlu2 %v593_v59 }
 0x142   : > { %v436_v16 = vpop.xlane.xlu0 %435 }
 0x143   : > { %v437_v17 = vrot.slane %v436_v16, 4 }
 0x145   : > { %v438_v18 = vadd.f32 %v437_v17, %v436_v16 }
 0x147   : > { %v439_v19 = vrot.slane %v438_v18, 2 }
 0x149   : > { %v440_v20 = vadd.f32 %v439_v19, %v438_v18 }
 0x14a   : > { %v451_v21 = vpop.xlane.xlu0 %450 }
 0x14b   : > { %v452_v22 = vrot.slane %v451_v21, 4  ;;  %v441_v23 = vrot.slane %v440_v20, 1 }
 0x14d   : > { %v453_v24 = vadd.f32 %v452_v22, %v451_v21  ;;  %v442_v25 = vadd.f32 %v441_v23, %v440_v20  ;;  %v580_v20 = vpop.xlane.xlu2 %579 }
 0x14e   : > { %v581_v22 = vrot.slane %v580_v20, 4 }
 0x14f   : > { %v454_v26 = vrot.slane %v453_v24, 2  ;;  %914 = vpush %v442_v25 }
 0x150   : > { %v582_v25 = vadd.f32 %v581_v22, %v580_v20 }
 0x151   : > { %v455_v27 = vadd.f32 %v454_v26, %v453_v24 }
 0x153   : > { %v456_v28 = vrot.slane %v455_v27, 1 }
 0x155   : > { %v457_v29 = vadd.f32 %v456_v28, %v455_v27  ;;  %v595_v21 = vpop.xlane.xlu2 %594  ;;  %v583_v27 = vrot.slane %v582_v25, 2 }
 0x156   : > { %v596_v23 = vrot.slane %v595_v21, 4 }
 0x157   : > { %916 = vpush %v457_v29 }
 0x158   : > { %v597_v26 = vadd.f32 %v596_v23, %v595_v21 }
 0x15a   : > { %v598_v29 = vrot.slane %v597_v26, 2 }
 0x180   : > { %s915_s21 = spop %914 }
 0x181   : > { %s1384_s23 = smul.f32 0.00390625, %s915_s21  ;;  %s477_s21 = sld [smem:[#allocation7 + %s1399_s20]] }
 0x183   : > { %s460_s10 = smul.f32 %s1384_s23, %s1384_s23 }
 0x188   : > { %s917_s8 = spop %916 }
 0x189   : > { %s459_s19 = smul.f32 0.00390625, %s917_s8 }
 0x18b   : > { %s461_s11 = ssub.f32 %s459_s19, %s460_s10 }
 0x18d   : > { %s463_s12 = sadd.f32 1e-05, %s461_s11 }
 0x18f   : > { %v464_v30 = vstv %s463_s12 }
 0x190   : > { %1046 = vrsqrt.f32 %v464_v30  ;;  %vm471_vm3 = vweird.f32 %v464_v30 }
 0x196   : > { %v1047_v31 = vpop.eup %1046 }
 0x197   : > { %v466_v32 = vmul.f32 %v1047_v31, %v464_v30  ;;  %vm472_vm2 = vweird.f32 %v1047_v31 }
 0x198   : > { %vm473_vm4 = vmor %vm471_vm3, %vm472_vm2 }
 0x199   : > { %v467_v33 = vmul.f32 %v1047_v31, %v466_v32  ;;  %v584_v32 = vadd.f32 %v583_v27, %v582_v25 }
 0x19b   : > { %v468_v34 = vmul.f32 0.5, %v467_v33  ;;  %v599_v33 = vadd.f32 %v598_v29, %v597_v26 }
 0x19d   : > { %v469_v35 = vsub.f32 1.5, %v468_v34 }
 0x19f   : > { %v470_v36 = vmul.f32 %v1047_v31, %v469_v35 }
 0x1a1   : > { %v474_v37 = vsel %vm473_vm4, %v1047_v31, %v470_v36  ;;  %v585_v36 = vrot.slane %v584_v32, 1 }
 0x1a2   : > { %918 = vpush %v474_v37  ;;  %v600_v37 = vrot.slane %v599_v33, 1 }
 0x1a3   : > { %v586_v40 = vadd.f32 %v585_v36, %v584_v32 }
 0x1a4   : > { %v601_v41 = vadd.f32 %v600_v37, %v599_v33 }
 0x1d3   : > { %s919_s10 = spop %918 }
 0x1d4   : > { %s476_s8 = smul.f32 %s919_s10, %s462_s4  ;;  %s547_s4 = sld [smem:[#allocation9 + %s1399_s20]] }
 0x1d6   : > { %s478_s19 = smul.f32 %s476_s8, %s1384_s23  ;;  %v480_v42 = vstv %s476_s8 }
 0x1d7   : > { %v481_v43 = vmul.f32 %v480_v42, %v1370_v6  ;;  %v482_v47 = vmul.f32 %v480_v42, %v1374_v8 }
 0x1d8   : > { %s479_s11 = ssub.f32 %s477_s21, %s478_s19 }
 0x1d9   : > { %s562_s21 = sld [smem:[#allocation10 + %s1399_s20]] }
 0x1da   : > { %v483_v44 = vstv %s479_s11 }
 0x1db   : > { %v484_v45 = vadd.f32 %v483_v44, %v481_v43  ;;  %v485_v48 = vadd.f32 %v483_v44, %v482_v47 }
 0x1dd   : > { %v486_v46 = vmax.f32 %v484_v45, 0.0  ;;  %v487_v49 = vmax.f32 %v485_v48, 0.0 }
 0x1df   : > { %897 = vmatmul.msk.f32.vlgmr.msra.gmra.mxu1 %vm431_vm1, %v486_v46 }
 0x1e7   : > { %898 = vmatmul.msk.f32.gmra.mxu1 %vm431_vm1, %v487_v49 }
 0x25c   : > { %v1422_v60 = vpop.f32.mrf.mxu1 }
 0x25d   : > { %v517_v62 = vsel %vm389_vm0, %v1422_v60, 0.0  ;;  %v530_v2 = vmul.f32 %v1422_v60, %v1422_v60 }
 0x25f   : > { %v532_v4 = vsel %vm389_vm0, %v530_v2, 0.0 }
 0x264   : > { %v1424_v61 = vpop.f32.mrf.mxu1 }
 0x265   : > { %v518_v63 = vsel %vm389_vm0, %v1424_v61, 0.0  ;;  %v531_v1 = vmul.f32 %v1424_v61, %v1424_v61 }
 0x266   : > { %v519_v0 = vadd.f32 %v518_v63, %v517_v62 }
 0x267   : > { %v533_v3 = vsel %vm389_vm0, %v531_v1, 0.0 }
 0x268   : > { %520 = vadd.xlane.f32.xlu1 %v519_v0  ;;  %v534_v5 = vadd.f32 %v533_v3, %v532_v4 }
 0x270   : > { %535 = vadd.xlane.f32.xlu1 %v534_v5 }
 0x2db   : > { %v521_v6 = vpop.xlane.xlu1 %520 }
 0x2dc   : > { %v522_v7 = vrot.slane %v521_v6, 4 }
 0x2de   : > { %v523_v8 = vadd.f32 %v522_v7, %v521_v6 }
 0x2e0   : > { %v524_v9 = vrot.slane %v523_v8, 2 }
 0x2e2   : > { %v525_v10 = vadd.f32 %v524_v9, %v523_v8 }
 0x2e3   : > { %v536_v11 = vpop.xlane.xlu1 %535 }
 0x2e4   : > { %v537_v12 = vrot.slane %v536_v11, 4  ;;  %v526_v13 = vrot.slane %v525_v10, 1 }
 0x2e6   : > { %v538_v14 = vadd.f32 %v537_v12, %v536_v11  ;;  %v527_v15 = vadd.f32 %v526_v13, %v525_v10 }
 0x2e8   : > { %v539_v16 = vrot.slane %v538_v14, 2  ;;  %920 = vpush %v527_v15 }
 0x2ea   : > { %v540_v17 = vadd.f32 %v539_v16, %v538_v14 }
 0x2ec   : > { %v541_v18 = vrot.slane %v540_v17, 1 }
 0x2ee   : > { %v542_v19 = vadd.f32 %v541_v18, %v540_v17 }
 0x2f0   : > { %922 = vpush %v542_v19 }
 0x319   : > { %s921_s22 = spop %920 }
 0x31a   : > { %s1436_s23 = smul.f32 0.001953125, %s921_s22 }
 0x31c   : > { %s545_s12 = smul.f32 %s1436_s23, %s1436_s23 }
 0x321   : > { %s923_s15 = spop %922 }
 0x322   : > { %s544_s18 = smul.f32 0.001953125, %s923_s15 }
 0x324   : > { %s546_s29 = ssub.f32 %s544_s18, %s545_s12 }
 0x326   : > { %s548_s9 = sadd.f32 1e-05, %s546_s29 }
 0x328   : > { %v549_v24 = vstv %s548_s9 }
 0x329   : > { %1048 = vrsqrt.f32 %v549_v24  ;;  %vm556_vm6 = vweird.f32 %v549_v24 }
 0x32f   : > { %v1049_v28 = vpop.eup %1048 }
 0x330   : > { %v551_v30 = vmul.f32 %v1049_v28, %v549_v24  ;;  %vm557_vm5 = vweird.f32 %v1049_v28 }
 0x331   : > { %vm558_vm7 = vmor %vm556_vm6, %vm557_vm5 }
 0x332   : > { %v552_v31 = vmul.f32 %v1049_v28, %v551_v30 }
 0x334   : > { %v553_v34 = vmul.f32 0.5, %v552_v31 }
 0x336   : > { %v554_v35 = vsub.f32 1.5, %v553_v34 }
 0x338   : > { %v555_v38 = vmul.f32 %v1049_v28, %v554_v35 }
 0x33a   : > { %v559_v39 = vsel %vm558_vm7, %v1049_v28, %v555_v38 }
 0x33b   : > { %924 = vpush %v559_v39 }
 0x33c   : > { %926 = vpush %v586_v40 }
 0x33d   : > { %928 = vpush %v601_v41 }
 0x36c   : > { %s925_s10 = spop %924 }
 0x36d   : > { %s561_s8 = smul.f32 %s925_s10, %s547_s4  ;;  %s927_s19 = spop %926 }
 0x36e   : > { %s1442_s11 = smul.f32 0.00390625, %s927_s19  ;;  %s929_s22 = spop %928 }
 0x36f   : > { %s563_s12 = smul.f32 %s561_s8, %s1436_s23  ;;  %v565_v42 = vstv %s561_s8  ;;  %s1451_s23 = scalar_lea.vmem [#allocation12], %s886_s16 }
 0x370   : > { %s604_s15 = smul.f32 %s1442_s11, %s1442_s11  ;;  %v566_v43 = vmul.f32 %v565_v42, %v1422_v60  ;;  %v567_v44 = vmul.f32 %v565_v42, %v1424_v61  ;;  %s1458_s16 = sadd.s32 1, %s1399_s20 }
 0x371   : > { %s564_s18 = ssub.f32 %s562_s21, %s563_s12  ;;  %s603_s29 = smul.f32 0.00390625, %s929_s22 }
 0x372   : > { %s606_s21 = sld [smem:[#allocation6 + %s1458_s16]] }
 0x373   : > { %v568_v45 = vstv %s564_s18  ;;  %s605_s9 = ssub.f32 %s603_s29, %s604_s15 }
 0x374   : > { %v569_v46 = vadd.f32 %v568_v45, %v566_v43  ;;  %v570_v47 = vadd.f32 %v568_v45, %v567_v44  ;;  %s621_s10 = sld [smem:[#allocation7 + %s1458_s16]] }
 0x375   : > { %s607_s4 = sadd.f32 1e-05, %s605_s9 }
 0x376   : > { %v571_v48 = vmax.f32 %v569_v46, 0.0  ;;  %v572_v49 = vmax.f32 %v570_v47, 0.0 }
 0x377   : > { %v608_v52 = vstv %s607_s4 }
 0x378   : > { %573 = vst.msk [vmem:[%s1451_s23] sm:$0xff] %vm389_vm0, %v571_v48  ;;  %1050 = vrsqrt.f32 %v608_v52  ;;  %vm615_vm9 = vweird.f32 %v608_v52 }
 0x379   : > { %574 = vst.msk [vmem:[%s1451_s23 + $0x10] sm:$0xff] %vm389_vm0, %v572_v49 }
 0x37e   : > { %v1051_v53 = vpop.eup %1050 }
 0x37f   : > { %v610_v54 = vmul.f32 %v1051_v53, %v608_v52  ;;  %vm616_vm8 = vweird.f32 %v1051_v53 }
 0x380   : > { %vm617_vm10 = vmor %vm615_vm9, %vm616_vm8 }
 0x381   : > { %v611_v55 = vmul.f32 %v1051_v53, %v610_v54 }
 0x383   : > { %v612_v56 = vmul.f32 0.5, %v611_v55 }
 0x385   : > { %v613_v57 = vsub.f32 1.5, %v612_v56 }
 0x387   : > { %v614_v58 = vmul.f32 %v1051_v53, %v613_v57 }
 0x389   : > { %v618_v59 = vsel %vm617_vm10, %v1051_v53, %v614_v58 }
 0x38a   : > { %930 = vpush %v618_v59 }
 0x3bb   : > { %s931_s8 = spop %930 }
 0x3bc   : > { %s620_s19 = smul.f32 %s931_s8, %s606_s21  ;;  %s691_s21 = sld [smem:[#allocation9 + %s1458_s16]] }
 0x3be   : > { %s622_s22 = smul.f32 %s620_s19, %s1442_s11  ;;  %v624_v60 = vstv %s620_s19 }
 0x3bf   : > { %v625_v61 = vmul.f32 %v624_v60, %v1408_v50  ;;  %v626_v1 = vmul.f32 %v624_v60, %v1410_v51 }
 0x3c0   : > { %s623_s12 = ssub.f32 %s621_s10, %s622_s22 }
 0x3c1   : > { %s706_s10 = sld [smem:[#allocation10 + %s1458_s16]] }
 0x3c2   : > { %v627_v62 = vstv %s623_s12 }
 0x3c3   : > { %v628_v63 = vadd.f32 %v627_v62, %v625_v61  ;;  %v629_v2 = vadd.f32 %v627_v62, %v626_v1 }
 0x3c5   : > { %v630_v0 = vmax.f32 %v628_v63, 0.0  ;;  %v631_v3 = vmax.f32 %v629_v2, 0.0 }
 0x3c7   : > { %899 = vmatmul.msk.f32.vlgmr.msra.gmra.mxu2 %vm431_vm1, %v630_v0 }
 0x3cf   : > { %900 = vmatmul.msk.f32.gmra.mxu2 %vm431_vm1, %v631_v3 }
 0x44a   : > { %v655_v4 = vpop.f32.mrf.mxu2 }
 0x44b   : > { %v674_v5 = vmul.f32 %v655_v4, %v655_v4  ;;  %v661_v9 = vsel %vm389_vm0, %v655_v4, 0.0 }
 0x44d   : > { %v676_v10 = vsel %vm389_vm0, %v674_v5, 0.0 }
 0x452   : > { %v658_v6 = vpop.f32.mrf.mxu2 }
 0x453   : > { %v662_v7 = vsel %vm389_vm0, %v658_v6, 0.0  ;;  %v675_v8 = vmul.f32 %v658_v6, %v658_v6 }
 0x454   : > { %v663_v50 = vadd.f32 %v662_v7, %v661_v9 }
 0x455   : > { %v677_v11 = vsel %vm389_vm0, %v675_v8, 0.0 }
 0x456   : > { %664 = vadd.xlane.f32.xlu0 %v663_v50  ;;  %v678_v51 = vadd.f32 %v677_v11, %v676_v10 }
 0x458   : > { %679 = vadd.xlane.f32.xlu1 %v678_v51 }
 0x4c9   : > { %v665_v12 = vpop.xlane.xlu0 %664 }
 0x4ca   : > { %v666_v13 = vrot.slane %v665_v12, 4 }
 0x4cb   : > { %v680_v14 = vpop.xlane.xlu1 %679 }
 0x4cc   : > { %v667_v15 = vadd.f32 %v666_v13, %v665_v12  ;;  %v681_v16 = vrot.slane %v680_v14, 4 }
 0x4ce   : > { %v668_v17 = vrot.slane %v667_v15, 2  ;;  %v682_v18 = vadd.f32 %v681_v16, %v680_v14 }
 0x4d0   : > { %v669_v19 = vadd.f32 %v668_v17, %v667_v15  ;;  %v683_v20 = vrot.slane %v682_v18, 2 }
 0x4d2   : > { %v684_v21 = vadd.f32 %v683_v20, %v682_v18  ;;  %v670_v22 = vrot.slane %v669_v19, 1 }
 0x4d4   : > { %v671_v23 = vadd.f32 %v670_v22, %v669_v19  ;;  %v685_v24 = vrot.slane %v684_v21, 1 }
 0x4d6   : > { %932 = vpush %v671_v23  ;;  %v686_v25 = vadd.f32 %v685_v24, %v684_v21 }
 0x4d8   : > { %934 = vpush %v686_v25 }
 0x507   : > { %s933_s20 = spop %932 }
 0x508   : > { %s673_s11 = smul.f32 0.001953125, %s933_s20  ;;  %s721_s20 = scalar_lea.sflag [#allocation4], %s1330_s17 }
 0x509   : > { %s935_s15 = spop %934 }
 0x50a   : > { %s689_s18 = smul.f32 %s673_s11, %s673_s11 }
 0x50b   : > { %s688_s29 = smul.f32 0.001953125, %s935_s15 }
 0x50d   : > { %s690_s9 = ssub.f32 %s688_s29, %s689_s18 }
 0x50f   : > { %s692_s4 = sadd.f32 1e-05, %s690_s9 }
 0x511   : > { %v693_v26 = vstv %s692_s4 }
 0x512   : > { %1052 = vrsqrt.f32 %v693_v26  ;;  %vm700_vm12 = vweird.f32 %v693_v26 }
 0x518   : > { %v1053_v27 = vpop.eup %1052 }
 0x519   : > { %v695_v28 = vmul.f32 %v1053_v27, %v693_v26  ;;  %vm701_vm11 = vweird.f32 %v1053_v27 }
 0x51a   : > { %vm702_vm13 = vmor %vm700_vm12, %vm701_vm11 }
 0x51b   : > { %v696_v29 = vmul.f32 %v1053_v27, %v695_v28 }
 0x51d   : > { %v697_v30 = vmul.f32 0.5, %v696_v29 }
 0x51f   : > { %v698_v31 = vsub.f32 1.5, %v697_v30 }
 0x521   : > { %v699_v32 = vmul.f32 %v1053_v27, %v698_v31 }
 0x523   : > { %v703_v33 = vsel %vm702_vm13, %v1053_v27, %v699_v32 }
 0x524   : > { %936 = vpush %v703_v33 }
 0x555   : > { %s937_s8 = spop %936 }
 0x556   : > { %s705_s19 = smul.f32 %s937_s8, %s691_s21 }
 0x558   : > { %s707_s22 = smul.f32 %s705_s19, %s673_s11  ;;  %v709_v34 = vstv %s705_s19 }
 0x559   : > { %v710_v35 = vmul.f32 %v709_v34, %v655_v4  ;;  %v711_v36 = vmul.f32 %v709_v34, %v658_v6 }
 0x55a   : > { %s708_s12 = ssub.f32 %s706_s10, %s707_s22 }
 0x55c   : > { %v712_v37 = vstv %s708_s12 }
 0x55d   : > { %v713_v38 = vadd.f32 %v712_v37, %v710_v35  ;;  %v714_v39 = vadd.f32 %v712_v37, %v711_v36 }
 0x55f   : > { %v715_v40 = vmax.f32 %v713_v38, 0.0  ;;  %v716_v41 = vmax.f32 %v714_v39, 0.0 }
 0x561   : > { %901 = vst.msk [vmem:[%s1451_s23 + $0x8] sm:$0xff] %vm389_vm0, %v715_v40 }
 0x562   : > { %902 = vst.msk [vmem:[%s1451_s23 + $0x18] sm:$0xff] %vm389_vm0, %v716_v41 }
 0x563   : > { %s909_s16 = sshll.u32 %s1244_s28, 4  ;;  %s743_s11 = sshll.u32 %s1451_s23, 4  ;;  %s744_s11 = int_to_ptr.vmem [resolvable:$true] %s743_s11 }
 0x564   : > { %s732_s29 = scalar_lea.hbm %s1522_s7, %s909_s16  ;;  %s1176_s4 = smov 256  }
 0x565   : > { %s745_s9 = sshll.u32 %s732_s29, 4  ;;  %963 = sst [smem:[#allocation16]] (%p1275_p11), %s1176_s4  ;;  %s746_s9 = int_to_ptr.hbm [resolvable:$true] %s745_s9 }
 0x566   : > { %s1177_s17 = smov 512   ;;  %s1178_s21 = smov 2  }
 0x567   : > { %964 = sst [smem:[#allocation16 + $0x1]] (%p1275_p11), %s1177_s17  ;;  %s1179_s28 = smov 128  }
 0x568   : > { %965 = sst [smem:[#allocation16 + $0x2]] (%p1275_p11), %s1178_s21  ;;  %s1180_s23 = smov 8  }
 0x569   : > { %966 = sst [smem:[#allocation16 + $0x3]] (%p1275_p11), %s1179_s28  ;;  %s1181_s10 = smov [#allocation15]  }
 0x56a   : > { %967 = sst [smem:[#allocation16 + $0x4]] (%p1275_p11), %s1179_s28  ;;  %s1182_s8 = smov 0  }
 0x56b   : > { %968 = sst [smem:[#allocation16 + $0x5]] (%p1275_p11), %s1180_s23 }
 0x56c   : > { %969 = dma.general (%p1275_p11), %s744_s11, 512, %s746_s9, %s721_s20, %s1181_s10, [#allocation16], %s1182_s8, 0  }
 0x56d PF: > { %s773_s19 = sand.u32 1, %s1152_s24   ;;  %p985_p3 = pnand %p879_p2, %p1279_p12 }
 0x56e   : > { %s774_s22 = scalar_lea.sflag [#allocation4], %s773_s19 }
 0x56f   : > { %p986_p4 = pneg %p985_p3 }
 0x571   : > { %1147 = dma.done.wait (%p986_p4), %s774_s22, 512  }
 0x572   : > { %1149 = vsyncadd (%p986_p4), %s774_s22, 4294966784  ;;  %s1531_s12 = sld [smem:[#allocation23_spill]]  ;;  %p23_p5 = scmp.ge.s32.totalorder %s1248_s30, 4  }
 0x573   : > { %s1532_s24 = smov %s1156_s25  ;;  %s1533_s25 = smov %s1160_s26 }
 0x574   : > { %s1535_s27 = smov %s1248_s30  ;;  %25 = sbr.rel (!%p23_p5) target bundleno = 10 (0xa), region = 121 }
 0x578   : > { %s1534_s26 = smov %s1531_s12 }
 0x579   :  { %780 = vsyncpa [#allocation3], 1 }
 0x57a   :  { %782 = vsyncpa [#allocation3 + $0x1], 1 }
 0x57b   :  { %783 = vsyncpa [#allocation4], 1 }
 0x57c   :  { %785 = vsyncpa [#allocation4 + $0x1], 1 }
 0x57d   :  { %786 = vsyncpa [#allocation5], 1 }
 0x57e   :  { %788 = vsyncpa [#allocation5 + $0x1], 1 }
 0x57f   :  { %789 = vsyncpa [#allocation8], 1 }
 0x580   :  { %790 = vsyncpa [#allocation11], 1 }

</bundles_post_ra>
